<compile_context>
chip_gen: v7x
topology: tpu7x:2x2x1
jax: 0.10.0
libtpu: 0.0.40
codegen_flags: <defaults>
</compile_context>

<pallas_src>
import functools

import jax
import jax.numpy as jnp
from jax.experimental import pallas as pl
from jax.experimental.pallas import tpu as pltpu


def _self_attentive_kernel(x_ref, w1_ref, w2_ref, out_ref, a_ref, *,
                           seq_len, compute_dtype):
    # x_ref:   (Bt*L, D)  flattened input block (wrapper-side reshape, GEMM-ready)
    # w1_ref:  (D, U)     full weight, VMEM resident (constant index_map)
    # w2_ref:  (U, H)     full weight, VMEM resident (constant index_map)
    # out_ref: (Bt, H, D)
    # a_ref:   (Bt, L, H) (transposed to (B, H, L) once in the wrapper)
    m_rows, feat = x_ref.shape
    num_heads = w2_ref.shape[1]
    bt = m_rows // seq_len

    xb = x_ref[...]                                   # (Bt*L, D) native dtype
    xc = xb.astype(compute_dtype)                     # bf16 operands feed the MXU

    # Projection GEMMs on the flattened (Bt*L, D) operand; f32 accumulation.
    hidden = jnp.tanh(
        jnp.dot(xc, w1_ref[...].astype(compute_dtype),
                preferred_element_type=jnp.float32))                  # (M, U) f32
    scores2d = jnp.dot(hidden.astype(compute_dtype),
                       w2_ref[...].astype(compute_dtype),
                       preferred_element_type=jnp.float32)            # (M, H) f32

    # Softmax over the sequence axis, f32, EXACT normalization (A is returned
    # to the caller as probabilities, so no approximate reciprocal here).
    scores = scores2d.reshape(bt, seq_len, num_heads)   # leading-dim split only
    m = jnp.max(scores, axis=1, keepdims=True)
    e = jnp.exp(scores - m)
    attn = e / jnp.sum(e, axis=1, keepdims=True)        # (Bt, L, H) f32
    a_ref[...] = attn.astype(a_ref.dtype)

    # out[b,h,d] = sum_l attn[b,l,h] * x[b,l,d]: batched contraction over the
    # sequence axis -- no explicit transpose of attn (no XLU vxpose).
    x3 = xb.reshape(bt, seq_len, feat).astype(compute_dtype)
    out = jnp.einsum("blh,bld->bhd", attn.astype(compute_dtype), x3,
                     preferred_element_type=jnp.float32)              # (Bt, H, D)
    out_ref[...] = out.astype(out_ref.dtype)


def _vmem_capacity_bytes():
    """Generation-aware VMEM capacity; conservative (v7x 64 MiB) if unknown."""
    try:
        info = pltpu.get_tpu_info()
        return int(getattr(info, "vmem_capacity_bytes", 64 << 20))
    except Exception:
        return 64 << 20


def _vmem_estimate(block_b, L, D, U, H, itemsize):
    m = block_b * L
    io = 2 * (m * D + block_b * H * D + block_b * L * H) * itemsize   # 2x-buffered blocks
    weights = 2 * (D * U + U * H) * itemsize                          # resident weights
    interm = 4 * (m * (U + H) + block_b * (L * H + H * D)) * 2        # f32 temps + headroom
    return io + weights + interm


def _pick_block_b(B, L, D, U, H, itemsize, vmem_budget, max_rows=4096):
    """Largest batch block whose working set fits the VMEM budget.

    Non-divisor block sizes are fine (the wrapper pads B up).  max_rows only
    bounds vreg pressure -- the VMEM budget is the real limiter.
    """
    best = 1
    for cand in range(1, B + 1):
        rows = cand * L
        if rows > max_rows and cand > 1:
            break
        if rows % 8 != 0 and cand < B:
            continue                      # keep the x-block sublane dim tile-aligned
        if _vmem_estimate(cand, L, D, U, H, itemsize) > vmem_budget:
            break
        best = cand
    # Two-TensorCore chips (v7x): prefer an even grid when splitting still
    # keeps the GEMM M dimension >= ~256 rows per step.
    if best >= B and B > 1:
        half = (B + 1) // 2
        if (half * L >= 256
                and _vmem_estimate(half, L, D, U, H, itemsize) <= vmem_budget):
            best = half
    return best


def self_attentive_layer(x, w1, w2, *, block_b=None, mxu_dtype=jnp.bfloat16):
    """x: (B, L, D); w1: (D, U) = ws1.weight.T; w2: (U, H) = ws2.weight.T.
    Returns (output (B, H, D), A (B, H, L)) -- same as the torch module."""
    B, L, D = x.shape
    U = w1.shape[1]
    H = w2.shape[1]
    itemsize = jnp.dtype(x.dtype).itemsize

    cap = _vmem_capacity_bytes()
    if cap >= (96 << 20):                 # v5e / v6e: 128 MiB VMEM per core
        pick_budget, limit_cap = 88 << 20, 100 << 20
    else:                                 # v7x: 64 MiB per TC (or unknown)
        pick_budget, limit_cap = 28 << 20, 48 << 20

    if block_b is None:
        block_b = _pick_block_b(B, L, D, U, H, itemsize, pick_budget)
    block_b = max(1, min(int(block_b), B))
    if (block_b * L) % 8 and block_b < B:
        block_b = B                       # keep the x-block sublane dim tile-aligned

    # Non-divisor B: pad the batch up (tail sliced off below) instead of
    # shrinking block_b down to a divisor.
    n_blocks = -(-B // block_b)
    b_pad = n_blocks * block_b
    if b_pad != B:
        x = jnp.pad(x, ((0, b_pad - B), (0, 0), (0, 0)))

    # Flatten to the GEMM-ready (B*L, D) layout in the wrapper (free in XLA);
    # the kernel then only does cheap leading-dim splits.
    x2 = x.reshape(b_pad * L, D)

    vmem_limit = int(min(max(2 * _vmem_estimate(block_b, L, D, U, H, itemsize),
                             4 << 20), limit_cap))

    kernel = functools.partial(_self_attentive_kernel,
                               seq_len=L, compute_dtype=mxu_dtype)

    grid_spec = pltpu.PrefetchScalarGridSpec(
        num_scalar_prefetch=0,
        grid=(n_blocks,),
        in_specs=[
            pl.BlockSpec((block_b * L, D), lambda b: (b, 0)),
            pl.BlockSpec((D, U), lambda b: (0, 0)),   # constant -> loaded once
            pl.BlockSpec((U, H), lambda b: (0, 0)),   # constant -> loaded once
        ],
        out_specs=[
            pl.BlockSpec((block_b, H, D), lambda b: (b, 0, 0)),
            pl.BlockSpec((block_b, L, H), lambda b: (b, 0, 0)),
        ],
    )

    cost = pl.CostEstimate(
        flops=2 * b_pad * L * (D * U + U * H + H * D),
        transcendentals=b_pad * L * (U + H),
        bytes_accessed=(b_pad * L * D + b_pad * H * D + b_pad * L * H
                        + D * U + U * H) * itemsize,
    )

    out, attn_lh = pl.pallas_call(
        kernel,
        out_shape=(jax.ShapeDtypeStruct((b_pad, H, D), x.dtype),
                   jax.ShapeDtypeStruct((b_pad, L, H), x.dtype)),
        grid_spec=grid_spec,
        compiler_params=pltpu.CompilerParams(
            dimension_semantics=("parallel",),        # batch blocks -> 2 TCs on v7x
            vmem_limit_bytes=vmem_limit),
        cost_estimate=cost,
    )(x2, w1, w2)

    # Strip batch padding; the module returns A already transposed to (B, H, L).
    return out[:B], jnp.swapaxes(attn_lh[:B], 1, 2)


def _reference(x, w1, w2):
    scores = jnp.tanh(x @ w1) @ w2                     # (B, L, H)
    attn = jax.nn.softmax(scores, axis=1)              # softmax over L
    attn_t = jnp.swapaxes(attn, 1, 2)                  # (B, H, L)
    out = jnp.einsum("bhl,bld->bhd", attn_t, x)        # (B, H, D)
    return out, attn_t


if __name__ == "__main__":
    key = jax.random.PRNGKey(0)
    k_x, k_w1, k_w2 = jax.random.split(key, 3)

    B, L, D = 8, 8, 32          # batch, seq, atten_in_dim
    U, H = 16, 5                # attention_unit, num_heads

    x = jax.random.normal(k_x, (B, L, D), dtype=jnp.float32)
    # deterministic init matching uniform_(-0.1, 0.1)
    w1 = jax.random.uniform(k_w1, (D, U), jnp.float32, -0.1, 0.1)
    w2 = jax.random.uniform(k_w2, (U, H), jnp.float32, -0.1, 0.1)

    out, attn = self_attentive_layer(x, w1, w2)        # auto block_b -> grid=(1,)
    out = jax.block_until_ready(out)
    attn = jax.block_until_ready(attn)

    ref_out, ref_attn = _reference(x, w1, w2)
    # bf16 MXU operands (f32 accumulation) give ~1e-3-level absolute error vs
    # the all-f32 reference; the softmax normalization itself is exact.
    assert jnp.allclose(out, ref_out, atol=2e-2, rtol=2e-2), "output mismatch"
    assert jnp.allclose(attn, ref_attn, atol=2e-2, rtol=2e-2), "attention mismatch"
    # Returned A rows are exact probabilities (exact divide, no approx recip).
    assert jnp.allclose(jnp.sum(attn, axis=-1), 1.0, atol=1e-5), "A rows must sum to 1"

    print("KERNEL_OK")
</pallas_src>

<mosaic_0001>
module attributes {stable_mosaic.version = 11 : i64} {
  func.func @_self_attentive_kernel(%arg0: i32, %arg1: memref<64x32xf32, #tpu.memory_space<vmem>>, %arg2: memref<32x16xf32, #tpu.memory_space<vmem>>, %arg3: memref<16x5xf32, #tpu.memory_space<vmem>>, %arg4: memref<8x5x32xf32, #tpu.memory_space<vmem>>, %arg5: memref<8x8x5xf32, #tpu.memory_space<vmem>>) attributes {dimension_semantics = [#tpu.dimension_semantics<parallel>], iteration_bounds = array<i64: 1>, scalar_prefetch = 0 : i64, scratch_operands = 0 : i64, tpu.core_type = #tpu.core_type<tc>, window_params = [{transform_indices = @transform_0, window_bounds = array<i64: 64, 32>}, {pipeline_mode = #tpu.pipeline_mode<synchronous>, transform_indices = @transform_1, window_bounds = array<i64: 32, 16>}, {pipeline_mode = #tpu.pipeline_mode<synchronous>, transform_indices = @transform_2, window_bounds = array<i64: 16, 5>}, {transform_indices = @transform_3, window_bounds = array<i64: 8, 5, 32>}, {transform_indices = @transform_4, window_bounds = array<i64: 8, 8, 5>}]} {
    %c0 = arith.constant 0 : index
    %c0_0 = arith.constant 0 : index
    %0 = vector.load %arg1[%c0, %c0_0] : memref<64x32xf32, #tpu.memory_space<vmem>>, vector<64x32xf32>
    %1 = arith.truncf %0 : vector<64x32xf32> to vector<64x32xbf16>
    %c0_1 = arith.constant 0 : index
    %c0_2 = arith.constant 0 : index
    %2 = vector.load %arg2[%c0_1, %c0_2] : memref<32x16xf32, #tpu.memory_space<vmem>>, vector<32x16xf32>
    %3 = arith.truncf %2 : vector<32x16xf32> to vector<32x16xbf16>
    %cst = arith.constant dense<0.000000e+00> : vector<64x16xf32>
    %4 = tpu.matmul %1, %3, %cst {dimension_numbers = #tpu.dot_dimension_numbers<[1], [0], [0], [1], [0, 0, 1, 1], [], []>} : vector<64x32xbf16>, vector<32x16xbf16>, vector<64x16xf32> -> vector<64x16xf32>
    %5 = math.tanh %4 : vector<64x16xf32>
    %6 = arith.truncf %5 : vector<64x16xf32> to vector<64x16xbf16>
    %c0_3 = arith.constant 0 : index
    %c0_4 = arith.constant 0 : index
    %7 = vector.load %arg3[%c0_3, %c0_4] : memref<16x5xf32, #tpu.memory_space<vmem>>, vector<16x5xf32>
    %8 = arith.truncf %7 : vector<16x5xf32> to vector<16x5xbf16>
    %cst_5 = arith.constant dense<0.000000e+00> : vector<64x5xf32>
    %9 = tpu.matmul %6, %8, %cst_5 {dimension_numbers = #tpu.dot_dimension_numbers<[1], [0], [0], [1], [0, 0, 1, 1], [], []>} : vector<64x16xbf16>, vector<16x5xbf16>, vector<64x5xf32> -> vector<64x5xf32>
    %10 = vector.shape_cast %9 : vector<64x5xf32> to vector<8x8x5xf32>
    %cst_6 = arith.constant dense<0xFF800000> : vector<8x5xf32>
    %11 = vector.multi_reduction <maximumf>, %10, %cst_6 [1] : vector<8x8x5xf32> to vector<8x5xf32>
    %12 = vector.shape_cast %11 : vector<8x5xf32> to vector<8x1x5xf32>
    %13 = vector.broadcast %12 : vector<8x1x5xf32> to vector<8x8x5xf32>
    %14 = arith.subf %10, %13 : vector<8x8x5xf32>
    %15 = math.exp %14 : vector<8x8x5xf32>
    %cst_7 = arith.constant dense<0.000000e+00> : vector<8x5xf32>
    %16 = vector.multi_reduction <add>, %15, %cst_7 [1] : vector<8x8x5xf32> to vector<8x5xf32>
    %17 = vector.shape_cast %16 : vector<8x5xf32> to vector<8x1x5xf32>
    %18 = vector.broadcast %17 : vector<8x1x5xf32> to vector<8x8x5xf32>
    %19 = arith.divf %15, %18 : vector<8x8x5xf32>
    %c0_8 = arith.constant 0 : index
    %c0_9 = arith.constant 0 : index
    %c0_10 = arith.constant 0 : index
    %20 = vector.load %arg5[%c0_8, %c0_9, %c0_10] : memref<8x8x5xf32, #tpu.memory_space<vmem>>, vector<8x8x5xf32>
    tpu.vector_store %arg5[%c0_8, %c0_9, %c0_10], %19 {strides = array<i32>} : memref<8x8x5xf32, #tpu.memory_space<vmem>>, vector<8x8x5xf32>,
    %21 = vector.shape_cast %0 : vector<64x32xf32> to vector<8x8x32xf32>
    %22 = arith.truncf %21 : vector<8x8x32xf32> to vector<8x8x32xbf16>
    %23 = arith.truncf %19 : vector<8x8x5xf32> to vector<8x8x5xbf16>
    "tpu.trace_start"() <{level = 10 : i32, message = "blh,bld->bhd"}> : () -> ()
    %cst_11 = arith.constant dense<0.000000e+00> : vector<8x5x32xf32>
    %24 = tpu.matmul %23, %22, %cst_11 {dimension_numbers = #tpu.dot_dimension_numbers<[1], [1], [2], [2], [0, 0, 0, 2, 1, 2], [0], [0]>} : vector<8x8x5xbf16>, vector<8x8x32xbf16>, vector<8x5x32xf32> -> vector<8x5x32xf32>
    "tpu.trace_stop"() : () -> ()
    %c0_12 = arith.constant 0 : index
    %c0_13 = arith.constant 0 : index
    %c0_14 = arith.constant 0 : index
    %25 = vector.load %arg4[%c0_12, %c0_13, %c0_14] : memref<8x5x32xf32, #tpu.memory_space<vmem>>, vector<8x5x32xf32>
    tpu.vector_store %arg4[%c0_12, %c0_13, %c0_14], %24 {strides = array<i32>} : memref<8x5x32xf32, #tpu.memory_space<vmem>>, vector<8x5x32xf32>,
    return
  }
  func.func @transform_0(%arg0: i32) -> (i32, i32) {
    %c0_i32 = arith.constant 0 : i32
    %c0_i32_0 = arith.constant 0 : i32
    return %arg0, %c0_i32 : i32, i32
  }
  func.func @transform_1(%arg0: i32) -> (i32, i32) {
    %c0_i32 = arith.constant 0 : i32
    %c0_i32_0 = arith.constant 0 : i32
    %c0_i32_1 = arith.constant 0 : i32
    return %c0_i32, %c0_i32_0 : i32, i32
  }
  func.func @transform_2(%arg0: i32) -> (i32, i32) {
    %c0_i32 = arith.constant 0 : i32
    %c0_i32_0 = arith.constant 0 : i32
    %c0_i32_1 = arith.constant 0 : i32
    return %c0_i32, %c0_i32_0 : i32, i32
  }
  func.func @transform_3(%arg0: i32) -> (i32, i32, i32) {
    %c0_i32 = arith.constant 0 : i32
    %c0_i32_0 = arith.constant 0 : i32
    %c0_i32_1 = arith.constant 0 : i32
    return %arg0, %c0_i32, %c0_i32_0 : i32, i32, i32
  }
  func.func @transform_4(%arg0: i32) -> (i32, i32, i32) {
    %c0_i32 = arith.constant 0 : i32
    %c0_i32_0 = arith.constant 0 : i32
    %c0_i32_1 = arith.constant 0 : i32
    return %arg0, %c0_i32, %c0_i32_0 : i32, i32, i32
  }
}

</mosaic_0001>

<bundles_post_ra>
// kernel: tpu_custom_call.1
= control target key start
LH: loop header
LB: loop body
LE: loop exit
PB: predicated region body
PF: predicated region fallthrough
CT: control target
= control target key end

     0   :  { %vm35_vm0 = vcmask 261120   ;;  %vm128_vm1 = vcmask 130048   ;;  %vm403_vm2 = vcmask 1043456   ;;  %v1062_v43 = vmov 0.0   ;;  %s1327_s1 = inlined_call_operand.vmem [shape: f32[32,16], index: 1, kind: input, shape index: {}]   ;;  %s1328_s0 = inlined_call_operand.vmem [shape: f32[64,32], index: 0, kind: input, shape index: {}]   ;;  %s1329_s2 = inlined_call_operand.vmem [shape: f32[16,5], index: 2, kind: input, shape index: {}]   ;;  %s1330_s4 = inlined_call_operand.vmem [shape: f32[8,8,5], index: 4, kind: output, shape index: {1}]   ;;  %s1331_s3 = inlined_call_operand.vmem [shape: f32[8,5,32], index: 3, kind: output, shape index: {0}]  }
   0x1   :  { %v29_v0 = vld [vmem:[%s1327_s1] sm:$0xff]  ;;  %v30_v1 = vld [vmem:[%s1327_s1 + $0x8] sm:$0xff]  ;;  %v31_v2 = vld [vmem:[%s1327_s1 + $0x10] sm:$0xff]  ;;  %vm206_vm3 = vcmask 39936   ;;  %vm1063_vm4 = vmmov 0   ;;  %vm399_vm5 = vcmask 64512  }
   0x2   :  { %v33_v3 = vpack.c.bf16 %v30_v1, %v29_v0  ;;  %v32_v4 = vld [vmem:[%s1327_s1 + $0x18] sm:$0xff]  ;;  %v1104_v5 = vld [vmem:[%s1328_s0] sm:$0xff]  ;;  %v1109_v6 = vld [vmem:[%s1328_s0 + $0x8] sm:$0xff]  ;;  %vm881_vm6 = vcmask 258048  }
   0x3   :  { %v34_v7 = vpack.c.bf16 %v32_v4, %v31_v2  ;;  %v25_v8 = vpack.c.bf16 %v1109_v6, %v1104_v5  ;;  %v1117_v9 = vld [vmem:[%s1328_s0 + $0x10] sm:$0xff]  ;;  %v1122_v10 = vld [vmem:[%s1328_s0 + $0x18] sm:$0xff]  ;;  %v1127_v11 = vld [vmem:[%s1328_s0 + $0x20] sm:$0xff]  ;;  %v367_v41 = vpack.c.bf16 %v1104_v5, %v1104_v5  ;;  %v368_v42 = vpack.c.bf16 %v1109_v6, %v1109_v6 }
   0x4   :  { %941 = vmatprep.subr.bf16.mxu0 %v33_v3  ;;  %v1132_v12 = vld [vmem:[%s1328_s0 + $0x28] sm:$0xff]  ;;  %v26_v13 = vpack.c.bf16 %v1122_v10, %v1117_v9  ;;  %v1143_v15 = vld [vmem:[%s1328_s0 + $0x30] sm:$0xff]  ;;  %v1148_v16 = vld [vmem:[%s1328_s0 + $0x38] sm:$0xff] }
   0x5   :  { %942 = vmatpush3.bf16.msra.mxu0 %v33_v3  ;;  %945 = vmatprep.mubr.msk.bf16.mxu0 %vm35_vm0, %v25_v8  ;;  %v27_v14 = vpack.c.bf16 %v1132_v12, %v1127_v11  ;;  %v28_v17 = vpack.c.bf16 %v1148_v16, %v1143_v15  ;;  %v125_v18 = vld [vmem:[%s1329_s2] sm:$0xff]  ;;  %v126_v19 = vld [vmem:[%s1329_s2 + $0x8] sm:$0xff]  ;;  %v405_v44 = vsel %vm403_vm2, %v367_v41, 0  ;;  %v467_v45 = vsel %vm403_vm2, %v368_v42, 0 }
   0x6   :  { %943 = vmatprep.subr.bf16.mxu0 %v34_v7  ;;  %v127_v20 = vpack.c.bf16 %v126_v19, %v125_v18 }
   0x8   :  { %953 = vmatprep.subr.bf16.mxu1 %v127_v20 }
   0x9   :  { %944 = vmatpush3.bf16.msra.mxu0 %v34_v7  ;;  %954 = vmatpush3.bf16.msra.mxu1 %v127_v20 }
   0xa   :  { %963 = vmatprep.subr.bf16.mxu1 %v1062_v43  ;;  %969 = vmatprep.subr.bf16.mxu0 %v1062_v43 }
   0xc   :  { %946 = vmatmul.mubr.msk.bf16.vlgmr.msra.gmra.mrb[0].mxu0 %vm35_vm0, %v26_v13 }
   0xd   :  { %949 = vmatprep.mubr.msk.bf16.mxu0 %vm35_vm0, %v27_v14  ;;  %970 = vmatpush3.bf16.msra.mxu0 %v467_v45 }
   0xe   :  { %981 = vmatprep.subr.bf16.mxu0 %v1062_v43 }
  0x14   :  { %950 = vmatmul.mubr.msk.bf16.gmra.mrb[4].mxu0 %vm35_vm0, %v28_v17 }
  0x15   :  { %971 = vmatprep.mubr.msk.bf16.mxu0 %vm1063_vm4, %v1062_v43 }
  0xdf   :  { %v947_v21 = vpop.f32.mrb[0].mxu0 }
  0xe0   :  { %1014 = vtanh.f32 %v947_v21  ;;  %v82_v22 = vpop.f32.mrb[1].mxu0 }
  0xe1   :  { %1016 = vtanh.f32 %v82_v22  ;;  %v948_v23 = vpop.f32.mrb[2].mxu0 }
  0xe2   :  { %1018 = vtanh.f32 %v948_v23  ;;  %v85_v24 = vpop.f32.mrb[3].mxu0 }
  0xe3   :  { %1020 = vtanh.f32 %v85_v24 }
  0xe7   :  { %v951_v25 = vpop.f32.mrb[4].mxu0 }
  0xe8   :  { %1022 = vtanh.f32 %v951_v25  ;;  %v98_v26 = vpop.f32.mrb[5].mxu0 }
  0xe9   :  { %1024 = vtanh.f32 %v98_v26  ;;  %v952_v27 = vpop.f32.mrb[6].mxu0 }
  0xea   :  { %v1015_v28 = vpop.eup %1014  ;;  %1026 = vtanh.f32 %v952_v27  ;;  %v101_v29 = vpop.f32.mrb[7].mxu0 }
  0xeb   :  { %v1017_v30 = vpop.eup %1016  ;;  %1028 = vtanh.f32 %v101_v29 }
  0xec   :  { %v1019_v31 = vpop.eup %1018 }
  0xed   :  { %v1021_v32 = vpop.eup %1020  ;;  %v122_v33 = vpack.c.bf16 %v1019_v31, %v1015_v28 }
  0xee   :  { %v121_v34 = vpack.c.bf16 %v1021_v32, %v1017_v30 }
  0xf0   :  { %955 = vmatprep.mubr.msk.bf16.mxu1 %vm128_vm1, %v121_v34 }
  0xf1   :  { %956 = vmatmul.mubr.msk.bf16.vlgmr.msra.gmra.mrb[0].mxu1 %vm128_vm1, %v122_v33 }
  0xf2   :  { %v1023_v35 = vpop.eup %1022  ;;  %964 = vmatpush3.bf16.msra.mxu1 %v405_v44 }
  0xf3   :  { %v1025_v36 = vpop.eup %1024  ;;  %975 = vmatprep.subr.bf16.mxu1 %v1062_v43 }
  0xf4   :  { %v1027_v37 = vpop.eup %1026 }
  0xf5   :  { %v1029_v38 = vpop.eup %1028  ;;  %v124_v39 = vpack.c.bf16 %v1027_v37, %v1023_v35 }
  0xf6   :  { %v123_v40 = vpack.c.bf16 %v1029_v38, %v1025_v36 }
  0xf8   :  { %959 = vmatprep.mubr.msk.bf16.mxu1 %vm128_vm1, %v123_v40 }
  0xf9   :  { %960 = vmatmul.mubr.msk.bf16.gmra.mrb[4].mxu1 %vm128_vm1, %v124_v39 }
  0xfa   :  { %965 = vmatprep.mubr.msk.bf16.mxu1 %vm1063_vm4, %v1062_v43 }
 0x1c4   :  { %v957_v46 = vpop.f32.mrb[0].mxu1 }
 0x1c5   :  { %v221_v47 = vsel %vm206_vm3, %v957_v46, -inf  ;;  %v175_v48 = vpop.f32.mrb[1].mxu1 }
 0x1c6   :  { %v222_v49 = vrot.slane %v221_v47, 4  ;;  %v207_v50 = vsel %vm206_vm3, %v175_v48, -inf  ;;  %v958_v51 = vpop.f32.mrb[2].mxu1 }
 0x1c7   :  { %v208_v52 = vrot.slane %v207_v50, 4  ;;  %v228_v53 = vsel %vm206_vm3, %v958_v51, -inf  ;;  %v178_v54 = vpop.f32.mrb[3].mxu1 }
 0x1c8   :  { %v223_v55 = vmax.f32 %v221_v47, %v222_v49  ;;  %v229_v56 = vrot.slane %v228_v53, 4  ;;  %v214_v57 = vsel %vm206_vm3, %v178_v54, -inf }
 0x1c9   :  { %v209_v58 = vmax.f32 %v207_v50, %v208_v52  ;;  %v215_v59 = vrot.slane %v214_v57, 4 }
 0x1ca   :  { %v224_v60 = vrot.slane %v223_v55, 2  ;;  %v230_v61 = vmax.f32 %v228_v53, %v229_v56 }
 0x1cb   :  { %v210_v62 = vrot.slane %v209_v58, 2  ;;  %v216_v63 = vmax.f32 %v214_v57, %v215_v59 }
 0x1cc   :  { %v225_v0 = vmax.f32 %v223_v55, %v224_v60  ;;  %v231_v1 = vrot.slane %v230_v61, 2  ;;  %v961_v2 = vpop.f32.mrb[4].mxu1 }
 0x1cd   :  { %v211_v3 = vmax.f32 %v209_v58, %v210_v62  ;;  %v217_v4 = vrot.slane %v216_v63, 2  ;;  %v249_v5 = vsel %vm206_vm3, %v961_v2, -inf  ;;  %v191_v6 = vpop.f32.mrb[5].mxu1 }
 0x1ce   :  { %v226_v7 = vrot.slane %v225_v0, 1  ;;  %v232_v8 = vmax.f32 %v230_v61, %v231_v1  ;;  %v250_v13 = vrot.slane %v249_v5, 4  ;;  %v235_v14 = vsel %vm206_vm3, %v191_v6, -inf  ;;  %v962_v17 = vpop.f32.mrb[6].mxu1 }
 0x1cf   :  { %v212_v18 = vrot.slane %v211_v3, 1  ;;  %v218_v19 = vmax.f32 %v216_v63, %v217_v4  ;;  %v236_v20 = vrot.slane %v235_v14, 4  ;;  %v256_v21 = vsel %vm206_vm3, %v962_v17, -inf  ;;  %v194_v22 = vpop.f32.mrb[7].mxu1 }
 0x1d0   :  { %v227_v23 = vmax.f32 %v225_v0, %v226_v7  ;;  %v233_v24 = vrot.slane %v232_v8, 1  ;;  %v251_v25 = vmax.f32 %v249_v5, %v250_v13  ;;  %v257_v26 = vrot.slane %v256_v21, 4 }
 0x1d1   :  { %v213_v27 = vmax.f32 %v211_v3, %v212_v18  ;;  %v219_v28 = vrot.slane %v218_v19, 1  ;;  %v237_v29 = vmax.f32 %v235_v14, %v236_v20  ;;  %v242_v30 = vsel %vm206_vm3, %v194_v22, -inf }
 0x1d2   :  { %v265_v31 = vsub.f32 %v957_v46, %v227_v23  ;;  %v234_v32 = vmax.f32 %v232_v8, %v233_v24  ;;  %v252_v33 = vrot.slane %v251_v25, 2  ;;  %v258_v34 = vmax.f32 %v256_v21, %v257_v26 }
 0x1d3   :  { %v263_v35 = vsub.f32 %v175_v48, %v213_v27  ;;  %v220_v36 = vmax.f32 %v218_v19, %v219_v28  ;;  %v238_v37 = vrot.slane %v237_v29, 2  ;;  %v243_v38 = vrot.slane %v242_v30, 4 }
 0x1d4   :  { %v275_v39 = vmul.f32 1.442695, %v265_v31  ;;  %v266_v40 = vsub.f32 %v958_v51, %v234_v32  ;;  %v253_v41 = vmax.f32 %v251_v25, %v252_v33  ;;  %v259_v42 = vrot.slane %v258_v34, 2 }
 0x1d5   :  { %v271_v44 = vmul.f32 1.442695, %v263_v35  ;;  %v264_v45 = vsub.f32 %v178_v54, %v220_v36  ;;  %v239_v47 = vmax.f32 %v237_v29, %v238_v37  ;;  %v244_v49 = vmax.f32 %v242_v30, %v243_v38 }
 0x1d6   :  { %1030 = vpow2.f32 %v275_v39  ;;  %v277_v50 = vmul.f32 1.442695, %v266_v40  ;;  %v254_v52 = vrot.slane %v253_v41, 1  ;;  %v260_v53 = vmax.f32 %v258_v34, %v259_v42 }
 0x1d7   :  { %1032 = vpow2.f32 %v271_v44  ;;  %v273_v46 = vmul.f32 1.442695, %v264_v45  ;;  %v240_v55 = vrot.slane %v239_v47, 1  ;;  %v245_v56 = vrot.slane %v244_v49, 2 }
 0x1d8   :  { %1034 = vpow2.f32 %v277_v50  ;;  %v255_v48 = vmax.f32 %v253_v41, %v254_v52  ;;  %v261_v57 = vrot.slane %v260_v53, 1 }
 0x1d9   :  { %1036 = vpow2.f32 %v273_v46  ;;  %v241_v58 = vmax.f32 %v239_v47, %v240_v55  ;;  %v246_v51 = vmax.f32 %v244_v49, %v245_v56 }
 0x1da   :  { %v269_v59 = vsub.f32 %v961_v2, %v255_v48  ;;  %v262_v60 = vmax.f32 %v260_v53, %v261_v57 }
 0x1db   :  { %v267_v61 = vsub.f32 %v191_v6, %v241_v58  ;;  %v247_v54 = vrot.slane %v246_v51, 1 }
 0x1dc   :  { %v283_v62 = vmul.f32 1.442695, %v269_v59  ;;  %v270_v63 = vsub.f32 %v962_v17, %v262_v60 }
 0x1dd   :  { %v279_v0 = vmul.f32 1.442695, %v267_v61  ;;  %v248_v1 = vmax.f32 %v246_v51, %v247_v54 }
 0x1de   :  { %1038 = vpow2.f32 %v283_v62  ;;  %v285_v3 = vmul.f32 1.442695, %v270_v63 }
 0x1df   :  { %1040 = vpow2.f32 %v279_v0  ;;  %v268_v4 = vsub.f32 %v194_v22, %v248_v1 }
 0x1e0   :  { %v1177_v5 = vpop.eup %1030  ;;  %1042 = vpow2.f32 %v285_v3 }
 0x1e1   :  { %v1179_v7 = vpop.eup %1032  ;;  %v301_v8 = vsel %vm206_vm3, %v1177_v5, 0.0  ;;  %v281_v2 = vmul.f32 1.442695, %v268_v4 }
 0x1e2   :  { %v1183_v13 = vpop.eup %1034  ;;  %v302_v6 = vrot.slane %v301_v8, 4  ;;  %v287_v14 = vsel %vm206_vm3, %v1179_v7, 0.0 }
 0x1e3   :  { %v1187_v17 = vpop.eup %1036  ;;  %v288_v18 = vrot.slane %v287_v14, 4  ;;  %v308_v19 = vsel %vm206_vm3, %v1183_v13, 0.0  ;;  %1044 = vpow2.f32 %v281_v2 }
 0x1e4   :  { %v303_v20 = vadd.f32 %v302_v6, %v301_v8  ;;  %v309_v21 = vrot.slane %v308_v19, 4  ;;  %v294_v22 = vsel %vm206_vm3, %v1187_v17, 0.0 }
 0x1e5   :  { %v289_v23 = vadd.f32 %v288_v18, %v287_v14  ;;  %v295_v24 = vrot.slane %v294_v22, 4 }
 0x1e6   :  { %v304_v25 = vrot.slane %v303_v20, 2  ;;  %v310_v26 = vadd.f32 %v309_v21, %v308_v19 }
 0x1e7   :  { %v290_v27 = vrot.slane %v289_v23, 2  ;;  %v296_v28 = vadd.f32 %v295_v24, %v294_v22 }
 0x1e8   :  { %v1197_v29 = vpop.eup %1038  ;;  %v311_v30 = vrot.slane %v310_v26, 2  ;;  %v305_v31 = vadd.f32 %v304_v25, %v303_v20 }
 0x1e9   :  { %v1199_v32 = vpop.eup %1040  ;;  %v297_v33 = vrot.slane %v296_v28, 2  ;;  %v329_v34 = vsel %vm206_vm3, %v1197_v29, 0.0  ;;  %v291_v35 = vadd.f32 %v290_v27, %v289_v23 }
 0x1ea   :  { %v1203_v36 = vpop.eup %1042  ;;  %v312_v37 = vadd.f32 %v311_v30, %v310_v26  ;;  %v330_v38 = vrot.slane %v329_v34, 4  ;;  %v315_v39 = vsel %vm206_vm3, %v1199_v32, 0.0  ;;  %v306_v40 = vrot.slane %v305_v31, 1 }
 0x1eb   :  { %v298_v41 = vadd.f32 %v297_v33, %v296_v28  ;;  %v316_v42 = vrot.slane %v315_v39, 4  ;;  %v336_v44 = vsel %vm206_vm3, %v1203_v36, 0.0  ;;  %v292_v45 = vrot.slane %v291_v35, 1 }
 0x1ec   :  { %v331_v47 = vadd.f32 %v330_v38, %v329_v34  ;;  %v337_v49 = vrot.slane %v336_v44, 4  ;;  %v307_v50 = vadd.f32 %v306_v40, %v305_v31  ;;  %v313_v52 = vrot.slane %v312_v37, 1 }
 0x1ed   :  { %v1209_v53 = vpop.eup %1044  ;;  %v317_v46 = vadd.f32 %v316_v42, %v315_v39  ;;  %v293_v55 = vadd.f32 %v292_v45, %v291_v35  ;;  %v299_v56 = vrot.slane %v298_v41, 1  ;;  %v369_v42 = vpack.c.bf16 %v1117_v9, %v1117_v9 }
 0x1ee   :  { %v332_v48 = vrot.slane %v331_v47, 2  ;;  %v338_v57 = vadd.f32 %v337_v49, %v336_v44  ;;  %v322_v58 = vsel %vm206_vm3, %v1209_v53, 0.0  ;;  %1046 = vrcp.f32 %v307_v50 }
 0x1ef   :  { %v318_v51 = vrot.slane %v317_v46, 2  ;;  %v323_v59 = vrot.slane %v322_v58, 4  ;;  %1048 = vrcp.f32 %v293_v55  ;;  %v314_v60 = vadd.f32 %v313_v52, %v312_v37 }
 0x1f0   :  { %v333_v61 = vadd.f32 %v332_v48, %v331_v47  ;;  %v339_v54 = vrot.slane %v338_v57, 2  ;;  %v300_v62 = vadd.f32 %v299_v56, %v298_v41  ;;  %v529_v44 = vsel %vm403_vm2, %v369_v42, 0 }
 0x1f1   :  { %v319_v63 = vadd.f32 %v318_v51, %v317_v46  ;;  %v324_v0 = vadd.f32 %v323_v59, %v322_v58  ;;  %1050 = vrcp.f32 %v314_v60  ;;  %v370_v45 = vpack.c.bf16 %v1122_v10, %v1122_v10 }
 0x1f2   :  { %v340_v1 = vadd.f32 %v339_v54, %v338_v57  ;;  %1052 = vrcp.f32 %v300_v62  ;;  %v334_v3 = vrot.slane %v333_v61, 1  ;;  %v371_v9 = vpack.c.bf16 %v1127_v11, %v1127_v11 }
 0x1f3   :  { %v325_v4 = vrot.slane %v324_v0, 2  ;;  %v320_v8 = vrot.slane %v319_v63, 1  ;;  %v591_v49 = vsel %vm403_vm2, %v370_v45, 0  ;;  %v373_v55 = vpack.c.bf16 %v1143_v15, %v1143_v15 }
 0x1f4   :  { %v335_v2 = vadd.f32 %v334_v3, %v333_v61  ;;  %v341_v6 = vrot.slane %v340_v1, 1  ;;  %v653_v10 = vsel %vm403_vm2, %v371_v9, 0  ;;  %v374_v48 = vpack.c.bf16 %v1148_v16, %v1148_v16 }
 0x1f5   :  { %v326_v14 = vadd.f32 %v325_v4, %v324_v0  ;;  %v321_v18 = vadd.f32 %v320_v8, %v319_v63 }
 0x1f6   :  { %1054 = vrcp.f32 %v335_v2  ;;  %v342_v19 = vadd.f32 %v341_v6, %v340_v1  ;;  %v839_v15 = vsel %vm403_vm2, %v374_v48, 0 }
 0x1f7   :  { %1056 = vrcp.f32 %v321_v18  ;;  %v327_v20 = vrot.slane %v326_v14, 1 }
 0x1f8   :  { %v1047_v21 = vpop.eup %1046  ;;  %1058 = vrcp.f32 %v342_v19 }
 0x1f9   :  { %v1049_v22 = vpop.eup %1048  ;;  %v348_v23 = vmul.f32 %v1047_v21, %v1177_v5  ;;  %v328_v24 = vadd.f32 %v327_v20, %v326_v14 }
 0x1fa   :  { %v344_v25 = vmul.f32 %v1049_v22, %v1179_v7 }
 0x1fb   :  { %v1051_v26 = vpop.eup %1050  ;;  %v377_v27 = vpack.c.bf16 %v348_v23, %v348_v23  ;;  %361 = vst.msk [vmem:[%s1330_s4 + $0x10] sm:$0xff] %vm206_vm3, %v348_v23  ;;  %1060 = vrcp.f32 %v328_v24 }
 0x1fc   :  { %v1053_v28 = vpop.eup %1052  ;;  %v375_v30 = vpack.c.bf16 %v344_v25, %v344_v25  ;;  %359 = vst.msk [vmem:[%s1330_s4] sm:$0xff] %vm206_vm3, %v344_v25  ;;  %v350_v5 = vmul.f32 %v1051_v26, %v1183_v13 }
 0x1fd   :  { %509 = vxpose.xlu1.c.b16.start.end [1/1] (short) (narrow) %v377_v27, 16  ;;  %v346_v7 = vmul.f32 %v1053_v28, %v1187_v17 }
 0x1fe   :  { %383 = vxpose.xlu0.c.b16.start.end [1/1] (short) (narrow) %v375_v30, 16  ;;  %362 = vst.msk [vmem:[%s1330_s4 + $0x18] sm:$0xff] %vm206_vm3, %v350_v5  ;;  %v378_v31 = vpack.c.bf16 %v350_v5, %v350_v5 }
 0x1ff   :  { %360 = vst.msk [vmem:[%s1330_s4 + $0x8] sm:$0xff] %vm206_vm3, %v346_v7  ;;  %v376_v34 = vpack.c.bf16 %v346_v7, %v346_v7 }
 0x200   :  { %v1055_v33 = vpop.eup %1054 }
 0x201   :  { %v1057_v35 = vpop.eup %1056  ;;  %571 = vxpose.xlu1.c.b16.start.end [1/1] (short) (narrow) %v378_v31, 16  ;;  %v356_v13 = vmul.f32 %v1055_v33, %v1197_v29 }
 0x202   :  { %v1059_v37 = vpop.eup %1058  ;;  %447 = vxpose.xlu0.c.b16.start.end [1/1] (short) (narrow) %v376_v34, 16  ;;  %v352_v17 = vmul.f32 %v1057_v35, %v1199_v32 }
 0x203   :  { %365 = vst.msk [vmem:[%s1330_s4 + $0x30] sm:$0xff] %vm206_vm3, %v356_v13  ;;  %v358_v38 = vmul.f32 %v1059_v37, %v1203_v36  ;;  %v381_v36 = vpack.c.bf16 %v356_v13, %v356_v13 }
 0x204   :  { %v379_v39 = vpack.c.bf16 %v352_v17, %v352_v17  ;;  %363 = vst.msk [vmem:[%s1330_s4 + $0x20] sm:$0xff] %vm206_vm3, %v352_v17 }
 0x205   :  { %v1061_v40 = vpop.eup %1060  ;;  %366 = vst.msk [vmem:[%s1330_s4 + $0x38] sm:$0xff] %vm206_vm3, %v358_v38  ;;  %v382_v41 = vpack.c.bf16 %v358_v38, %v358_v38 }
 0x206   :  { %633 = vxpose.xlu0.c.b16.start.end [1/1] (short) (narrow) %v379_v39, 16  ;;  %v354_v29 = vmul.f32 %v1061_v40, %v1209_v53  ;;  %v372_v53 = vpack.c.bf16 %v1132_v12, %v1132_v12  ;;  %v777_v12 = vsel %vm403_vm2, %v373_v55, 0 }
 0x208   :  { %v380_v32 = vpack.c.bf16 %v354_v29, %v354_v29  ;;  %364 = vst.msk [vmem:[%s1330_s4 + $0x28] sm:$0xff] %vm206_vm3, %v354_v29  ;;  %v715_v11 = vsel %vm403_vm2, %v372_v53, 0 }
 0x20a   :  { %695 = vxpose.xlu1.c.b16.start.end [1/1] (short) (narrow) %v380_v32, 16  ;;  %757 = vxpose.xlu0.c.b16.start.end [1/1] (short) (narrow) %v381_v36, 16 }
 0x20e   :  { %819 = vxpose.xlu1.c.b16.start.end [1/1] (short) (narrow) %v382_v41, 16 }
 0x263   :  { %v517_v52 = vpop.trf.xlu1 }
 0x264   :  { %v391_v47 = vpop.trf.xlu0 }
 0x265   :  { %966 = vmatmul.mubr.msk.bf16.vlgmr.msra.gmra.mrb[8].mxu1 %vm399_vm5, %v391_v47 }
 0x266   :  { %976 = vmatpush3.bf16.msra.mxu1 %v529_v44  ;;  %977 = vmatprep.mubr.msk.bf16.mxu1 %vm1063_vm4, %v1062_v43 }
 0x267   :  { %987 = vmatprep.subr.bf16.mxu1 %v1062_v43  ;;  %v579_v46 = vpop.trf.xlu1 }
 0x268   :  { %v455_v50 = vpop.trf.xlu0 }
 0x269   :  { %972 = vmatmul.mubr.msk.bf16.vlgmr.msra.gmra.mrb[8].mxu0 %vm399_vm5, %v455_v50 }
 0x26a   :  { %982 = vmatpush3.bf16.msra.mxu0 %v591_v49  ;;  %983 = vmatprep.mubr.msk.bf16.mxu0 %vm1063_vm4, %v1062_v43 }
 0x26b   :  { %993 = vmatprep.subr.bf16.mxu0 %v1062_v43 }
 0x26c   :  { %v641_v56 = vpop.trf.xlu0 }
 0x26d   :  { %978 = vmatmul.mubr.msk.bf16.vlgmr.msra.gmra.mrb[12].mxu1 %vm399_vm5, %v517_v52 }
 0x26e   :  { %988 = vmatpush3.bf16.msra.mxu1 %v653_v10  ;;  %989 = vmatprep.mubr.msk.bf16.mxu1 %vm1063_vm4, %v1062_v43 }
 0x26f   :  { %999 = vmatprep.subr.bf16.mxu1 %v1062_v43 }
 0x270   :  { %v703_v57 = vpop.trf.xlu1  ;;  %v765_v58 = vpop.trf.xlu0 }
 0x271   :  { %984 = vmatmul.mubr.msk.bf16.vlgmr.msra.gmra.mrb[12].mxu0 %vm399_vm5, %v579_v46 }
 0x272   :  { %994 = vmatpush3.bf16.msra.mxu0 %v715_v11  ;;  %995 = vmatprep.mubr.msk.bf16.mxu0 %vm1063_vm4, %v1062_v43 }
 0x273   :  { %1005 = vmatprep.subr.bf16.mxu0 %v1062_v43 }
 0x274   :  { %v827_v51 = vpop.trf.xlu1 }
 0x275   :  { %990 = vmatmul.mubr.msk.bf16.vlgmr.msra.gmra.mrb[16].mxu1 %vm399_vm5, %v641_v56 }
 0x276   :  { %1000 = vmatpush3.bf16.msra.mxu1 %v777_v12  ;;  %1001 = vmatprep.mubr.msk.bf16.mxu1 %vm1063_vm4, %v1062_v43 }
 0x279   :  { %996 = vmatmul.mubr.msk.bf16.vlgmr.msra.gmra.mrb[16].mxu0 %vm399_vm5, %v703_v57 }
 0x27a   :  { %1006 = vmatpush3.bf16.msra.mxu0 %v839_v15  ;;  %1007 = vmatprep.mubr.msk.bf16.mxu0 %vm1063_vm4, %v1062_v43 }
 0x27d   :  { %1002 = vmatmul.mubr.msk.bf16.vlgmr.msra.gmra.mrb[20].mxu1 %vm399_vm5, %v765_v58 }
 0x281   :  { %1008 = vmatmul.mubr.msk.bf16.vlgmr.msra.gmra.mrb[20].mxu0 %vm399_vm5, %v827_v51 }
 0x338   :  { %v441_v16 = vpop.f32.mrb[8].mxu1 }
 0x339   :  { %882 = vst.msk [vmem:[%s1331_s3] sm:$0x1f] %vm881_vm6, %v441_v16  ;;  %v967_v59 = vpop.f32.mrb[9].mxu1 }
 0x33a   :  { %v444_v60 = vpop.f32.mrb[10].mxu1 }
 0x33b   :  { %v968_v61 = vpop.f32.mrb[11].mxu1 }
 0x33c   :  { %v503_v54 = vpop.f32.mrb[8].mxu0 }
 0x33d   :  { %883 = vst.msk [vmem:[%s1331_s3 + $0x8] sm:$0x1f] %vm881_vm6, %v503_v54  ;;  %v973_v43 = vpop.f32.mrb[9].mxu0 }
 0x33e   :  { %v506_v62 = vpop.f32.mrb[10].mxu0 }
 0x33f   :  { %v974_v63 = vpop.f32.mrb[11].mxu0 }
 0x340   :  { %v565_v0 = vpop.f32.mrb[12].mxu1 }
 0x341   :  { %884 = vst.msk [vmem:[%s1331_s3 + $0x10] sm:$0x1f] %vm881_vm6, %v565_v0  ;;  %v979_v1 = vpop.f32.mrb[13].mxu1 }
 0x342   :  { %v568_v3 = vpop.f32.mrb[14].mxu1 }
 0x343   :  { %v980_v4 = vpop.f32.mrb[15].mxu1 }
 0x344   :  { %v627_v8 = vpop.f32.mrb[12].mxu0 }
 0x345   :  { %885 = vst.msk [vmem:[%s1331_s3 + $0x18] sm:$0x1f] %vm881_vm6, %v627_v8  ;;  %v985_v2 = vpop.f32.mrb[13].mxu0 }
 0x346   :  { %v630_v6 = vpop.f32.mrb[14].mxu0 }
 0x347   :  { %v986_v14 = vpop.f32.mrb[15].mxu0 }
 0x348   :  { %v689_v18 = vpop.f32.mrb[16].mxu1 }
 0x349   :  { %886 = vst.msk [vmem:[%s1331_s3 + $0x20] sm:$0x1f] %vm881_vm6, %v689_v18  ;;  %v991_v19 = vpop.f32.mrb[17].mxu1 }
 0x34a   :  { %v692_v20 = vpop.f32.mrb[18].mxu1 }
 0x34b   :  { %v992_v21 = vpop.f32.mrb[19].mxu1 }
 0x34c   :  { %v751_v22 = vpop.f32.mrb[16].mxu0 }
 0x34d   :  { %887 = vst.msk [vmem:[%s1331_s3 + $0x28] sm:$0x1f] %vm881_vm6, %v751_v22  ;;  %v997_v23 = vpop.f32.mrb[17].mxu0 }
 0x34e   :  { %v754_v24 = vpop.f32.mrb[18].mxu0 }
 0x34f   :  { %v998_v25 = vpop.f32.mrb[19].mxu0 }
 0x350   :  { %v813_v26 = vpop.f32.mrb[20].mxu1 }
 0x351   :  { %888 = vst.msk [vmem:[%s1331_s3 + $0x30] sm:$0x1f] %vm881_vm6, %v813_v26  ;;  %v1003_v27 = vpop.f32.mrb[21].mxu1 }
 0x352   :  { %v816_v28 = vpop.f32.mrb[22].mxu1 }
 0x353   :  { %v1004_v30 = vpop.f32.mrb[23].mxu1 }
 0x354   :  { %v875_v5 = vpop.f32.mrb[20].mxu0 }
 0x355   :  { %889 = vst.msk [vmem:[%s1331_s3 + $0x38] sm:$0x1f] %vm881_vm6, %v875_v5  ;;  %v1009_v7 = vpop.f32.mrb[21].mxu0 }
 0x356   :  { %v878_v31 = vpop.f32.mrb[22].mxu0 }
 0x357   :  { %v1010_v33 = vpop.f32.mrb[23].mxu0 }

</bundles_post_ra>
